<compile_context>
chip_gen: v7x
topology: tpu7x:2x2x1
jax: 0.10.0
libtpu: 0.0.40
codegen_flags: <defaults>
</compile_context>

<pallas_src>
import functools

import jax
import jax.numpy as jnp
from jax.experimental import pallas as pl
from jax.experimental.pallas import tpu as pltpu


def _round_up(n, m):
    return ((n + m - 1) // m) * m


def _pick_block(padded_dim, candidates=(512, 256, 128)):
    """Largest candidate tile (multiple of 128) that evenly divides padded_dim."""
    for c in candidates:
        if padded_dim % c == 0:
            return c
    return padded_dim


def _mlp_kernel(x_ref, w1_ref, b1_ref, w2_ref, b2_ref, o_ref, acc_ref, *,
                use_relu):
    k = pl.program_id(2)

    @pl.when(k == 0)
    def _():
        acc_ref[...] = jnp.zeros_like(acc_ref)

    # First linear, this HID chunk: (TB, IN) @ (IN, TH) -> (TB, TH), f32 acc.
    h = jnp.dot(x_ref[...], w1_ref[...], preferred_element_type=jnp.float32)
    h = h + b1_ref[...]            # (1, TH) broadcasts over rows
    if use_relu:                   # static Python flag, baked at trace time
        h = jnp.maximum(h, 0.0)

    # Second linear partial product, accumulated over HID chunks on the MXU.
    acc_ref[...] += jnp.dot(h.astype(w2_ref.dtype), w2_ref[...],
                            preferred_element_type=jnp.float32)

    @pl.when(k == pl.num_programs(2) - 1)
    def _():
        o_ref[...] = (acc_ref[...] + b2_ref[...]).astype(o_ref.dtype)


def mlp_forward(x, w1, b1, w2, b2, *, use_relu=True,
                block_b=None, block_h=None, block_n=None):
    """Fused MLP forward.

    x  : (B, IN)
    w1 : (IN, HID),  b1 : (HID,)
    w2 : (HID, OUT), b2 : (OUT,)
    returns (B, OUT)
    """
    B, IN = x.shape
    HID = w1.shape[1]
    OUT = w2.shape[1]
    dtype = x.dtype
    itemsize = jnp.dtype(dtype).itemsize
    sub = 16 if jnp.dtype(dtype) == jnp.bfloat16 else 8  # sublane packing

    # Pad feature dims to lane multiples (128); pick MXU-friendly tiles.
    IN_pad = _round_up(IN, 128)
    HID_pad = _round_up(HID, 128)
    OUT_pad = _round_up(OUT, 128)

    if block_b is None:
        # 256 rows (f32) / 512 rows (bf16): keeps the MXU fed while leaving
        # VMEM headroom on v7x (64 MiB physical). Never larger than the batch.
        block_b = min(512 if jnp.dtype(dtype) == jnp.bfloat16 else 256,
                      _round_up(B, sub))
    block_b = _round_up(block_b, sub)
    if block_h is None:
        block_h = _pick_block(HID_pad)
    if block_n is None:
        block_n = _pick_block(OUT_pad)
    assert HID_pad % block_h == 0 and block_h % 128 == 0
    assert OUT_pad % block_n == 0 and block_n % 128 == 0

    B_pad = _round_up(B, block_b)

    # Zero padding is exact: padded hidden units see h = relu(0 + 0) = 0 and
    # padded rows/cols are sliced off below.
    if (B_pad, IN_pad) != (B, IN):
        x = jnp.pad(x, ((0, B_pad - B), (0, IN_pad - IN)))
    if (IN_pad, HID_pad) != (IN, HID):
        w1 = jnp.pad(w1, ((0, IN_pad - IN), (0, HID_pad - HID)))
    if HID_pad != HID:
        b1 = jnp.pad(b1, (0, HID_pad - HID))
    if (HID_pad, OUT_pad) != (HID, OUT):
        w2 = jnp.pad(w2, ((0, HID_pad - HID), (0, OUT_pad - OUT)))
    if OUT_pad != OUT:
        b2 = jnp.pad(b2, (0, OUT_pad - OUT))
    b1_2d = b1.reshape(1, HID_pad)
    b2_2d = b2.reshape(1, OUT_pad)

    grid = (B_pad // block_b, OUT_pad // block_n, HID_pad // block_h)

    # Per-step VMEM working set: double-buffered input/output blocks
    # + f32 accumulator scratch + f32 intermediate h. Cap at 64 MiB (v7x).
    work = 2 * (block_b * IN_pad + IN_pad * block_h + block_h
                + block_h * block_n + block_n
                + block_b * block_n) * itemsize
    work += block_b * block_n * 4 + block_b * block_h * 4
    vmem_limit = int(min(max(2 * work, 32 * 1024 * 1024), 64 * 1024 * 1024))

    cost = pl.CostEstimate(
        flops=2 * B_pad * HID_pad * (IN_pad + OUT_pad),
        transcendentals=0,
        bytes_accessed=int((x.size + w1.size + b1_2d.size + w2.size
                            + b2_2d.size + B_pad * OUT_pad) * itemsize),
    )

    kernel = functools.partial(_mlp_kernel, use_relu=use_relu)

    out_padded = pl.pallas_call(
        kernel,
        out_shape=jax.ShapeDtypeStruct((B_pad, OUT_pad), dtype),
        grid_spec=pltpu.PrefetchScalarGridSpec(
            num_scalar_prefetch=0,
            grid=grid,
            in_specs=[
                pl.BlockSpec((block_b, IN_pad), lambda i, j, k: (i, 0)),
                pl.BlockSpec((IN_pad, block_h), lambda i, j, k: (0, k)),
                pl.BlockSpec((1, block_h), lambda i, j, k: (0, k)),
                pl.BlockSpec((block_h, block_n), lambda i, j, k: (k, j)),
                pl.BlockSpec((1, block_n), lambda i, j, k: (0, j)),
            ],
            out_specs=pl.BlockSpec((block_b, block_n), lambda i, j, k: (i, j)),
            scratch_shapes=[pltpu.VMEM((block_b, block_n), jnp.float32)],
        ),
        compiler_params=pltpu.CompilerParams(
            dimension_semantics=("parallel", "parallel", "arbitrary"),
            vmem_limit_bytes=vmem_limit,
        ),
        cost_estimate=cost,
    )(x, w1, b1_2d, w2, b2_2d)

    return out_padded[:B, :OUT]


def init_mlp_params(key, in_size, hidden_size, out_size, dtype=jnp.float32):
    """Deterministic init matching nn.Linear's default U(-1/sqrt(fan_in), +)."""
    k1, k2, k3, k4 = jax.random.split(key, 4)
    bound1 = 1.0 / (in_size ** 0.5)
    bound2 = 1.0 / (hidden_size ** 0.5)
    # Stored as (in, out) == PyTorch weight.T
    w1 = jax.random.uniform(k1, (in_size, hidden_size), dtype, -bound1, bound1)
    b1 = jax.random.uniform(k2, (hidden_size,), dtype, -bound1, bound1)
    w2 = jax.random.uniform(k3, (hidden_size, out_size), dtype, -bound2, bound2)
    b2 = jax.random.uniform(k4, (out_size,), dtype, -bound2, bound2)
    return w1, b1, w2, b2


if __name__ == "__main__":
    # Small shapes consistent with the module's forward (x is (batch, in_size)).
    # batch=384 is ragged w.r.t. the 256-row tile so both the multi-step batch
    # grid and the padding path are exercised.
    batch, in_size, hidden_size, out_size = 384, 16, 32, 8

    key = jax.random.PRNGKey(0)
    kx, kp = jax.random.split(key)
    x = jax.random.normal(kx, (batch, in_size), jnp.float32)
    w1, b1, w2, b2 = init_mlp_params(kp, in_size, hidden_size, out_size)

    for use_relu in (True, False):
        out = mlp_forward(x, w1, b1, w2, b2, use_relu=use_relu)
        out = jax.block_until_ready(out)

        # Pure-JAX reference check.
        h_ref = x @ w1 + b1
        if use_relu:
            h_ref = jnp.maximum(h_ref, 0.0)
        y_ref = h_ref @ w2 + b2
        assert out.shape == (batch, out_size)
        assert jnp.allclose(out, y_ref, atol=2e-5, rtol=2e-5), (
            f"mismatch (use_relu={use_relu}): "
            f"max abs err {jnp.max(jnp.abs(out - y_ref))}")

    print("KERNEL_OK")
</pallas_src>

<mosaic_0001>
module attributes {stable_mosaic.version = 11 : i64} {
  func.func @_mlp_kernel(%arg0: i32, %arg1: i32, %arg2: i32, %arg3: memref<256x128xf32, #tpu.memory_space<vmem>>, %arg4: memref<128x128xf32, #tpu.memory_space<vmem>>, %arg5: memref<1x128xf32, #tpu.memory_space<vmem>>, %arg6: memref<128x128xf32, #tpu.memory_space<vmem>>, %arg7: memref<1x128xf32, #tpu.memory_space<vmem>>, %arg8: memref<256x128xf32, #tpu.memory_space<vmem>>, %arg9: memref<256x128xf32, #tpu.memory_space<vmem>>) attributes {dimension_semantics = [#tpu.dimension_semantics<parallel>, #tpu.dimension_semantics<parallel>, #tpu.dimension_semantics<arbitrary>], iteration_bounds = array<i64: 2, 1, 1>, scalar_prefetch = 0 : i64, scratch_operands = 1 : i64, tpu.core_type = #tpu.core_type<tc>, window_params = [{transform_indices = @transform_0, window_bounds = array<i64: 256, 128>}, {transform_indices = @transform_1, window_bounds = array<i64: 128, 128>}, {transform_indices = @transform_2, window_bounds = array<i64: 1, 128>}, {transform_indices = @transform_3, window_bounds = array<i64: 128, 128>}, {transform_indices = @transform_4, window_bounds = array<i64: 1, 128>}, {transform_indices = @transform_5, window_bounds = array<i64: 256, 128>}]} {
    %c0_i32 = arith.constant 0 : i32
    %0 = arith.cmpi eq, %arg2, %c0_i32 : i32
    %1 = arith.extui %0 : i1 to i32
    %c0_i32_0 = arith.constant 0 : i32
    %2 = arith.cmpi ne, %1, %c0_i32_0 : i32
    scf.if %2 {
      %cst_16 = arith.constant 0.000000e+00 : f32
      %19 = vector.broadcast %cst_16 : f32 to vector<256x128xf32>
      %c0_17 = arith.constant 0 : index
      %c0_18 = arith.constant 0 : index
      %20 = vector.load %arg9[%c0_17, %c0_18] : memref<256x128xf32, #tpu.memory_space<vmem>>, vector<256x128xf32>
      tpu.vector_store %arg9[%c0_17, %c0_18], %19 {strides = array<i32>} : memref<256x128xf32, #tpu.memory_space<vmem>>, vector<256x128xf32>,
    } else {
    }
    %c0 = arith.constant 0 : index
    %c0_1 = arith.constant 0 : index
    %3 = vector.load %arg3[%c0, %c0_1] : memref<256x128xf32, #tpu.memory_space<vmem>>, vector<256x128xf32>
    %c0_2 = arith.constant 0 : index
    %c0_3 = arith.constant 0 : index
    %4 = vector.load %arg4[%c0_2, %c0_3] : memref<128x128xf32, #tpu.memory_space<vmem>>, vector<128x128xf32>
    %cst = arith.constant dense<0.000000e+00> : vector<256x128xf32>
    %5 = tpu.matmul %3, %4, %cst {dimension_numbers = #tpu.dot_dimension_numbers<[1], [0], [0], [1], [0, 0, 1, 1], [], []>} : vector<256x128xf32>, vector<128x128xf32>, vector<256x128xf32> -> vector<256x128xf32>
    %c0_4 = arith.constant 0 : index
    %c0_5 = arith.constant 0 : index
    %6 = vector.load %arg5[%c0_4, %c0_5] : memref<1x128xf32, #tpu.memory_space<vmem>>, vector<1x128xf32>
    %7 = vector.broadcast %6 : vector<1x128xf32> to vector<256x128xf32>
    %8 = arith.addf %5, %7 : vector<256x128xf32>
    %cst_6 = arith.constant 0.000000e+00 : f32
    %9 = vector.broadcast %cst_6 : f32 to vector<256x128xf32>
    %10 = arith.maximumf %8, %9 : vector<256x128xf32>
    %c0_7 = arith.constant 0 : index
    %c0_8 = arith.constant 0 : index
    %11 = vector.load %arg9[%c0_7, %c0_8] : memref<256x128xf32, #tpu.memory_space<vmem>>, vector<256x128xf32>
    %c0_9 = arith.constant 0 : index
    %c0_10 = arith.constant 0 : index
    %12 = vector.load %arg6[%c0_9, %c0_10] : memref<128x128xf32, #tpu.memory_space<vmem>>, vector<128x128xf32>
    %cst_11 = arith.constant dense<0.000000e+00> : vector<256x128xf32>
    %13 = tpu.matmul %10, %12, %cst_11 {dimension_numbers = #tpu.dot_dimension_numbers<[1], [0], [0], [1], [0, 0, 1, 1], [], []>} : vector<256x128xf32>, vector<128x128xf32>, vector<256x128xf32> -> vector<256x128xf32>
    %14 = arith.addf %11, %13 : vector<256x128xf32>
    %c0_12 = arith.constant 0 : index
    %c0_13 = arith.constant 0 : index
    %15 = vector.load %arg9[%c0_12, %c0_13] : memref<256x128xf32, #tpu.memory_space<vmem>>, vector<256x128xf32>
    tpu.vector_store %arg9[%c0_12, %c0_13], %14 {strides = array<i32>} : memref<256x128xf32, #tpu.memory_space<vmem>>, vector<256x128xf32>,
    %c0_i32_14 = arith.constant 0 : i32
    %16 = arith.cmpi eq, %arg2, %c0_i32_14 : i32
    %17 = arith.extui %16 : i1 to i32
    %c0_i32_15 = arith.constant 0 : i32
    %18 = arith.cmpi ne, %17, %c0_i32_15 : i32
    scf.if %18 {
      %c0_16 = arith.constant 0 : index
      %c0_17 = arith.constant 0 : index
      %19 = vector.load %arg9[%c0_16, %c0_17] : memref<256x128xf32, #tpu.memory_space<vmem>>, vector<256x128xf32>
      %c0_18 = arith.constant 0 : index
      %c0_19 = arith.constant 0 : index
      %20 = vector.load %arg7[%c0_18, %c0_19] : memref<1x128xf32, #tpu.memory_space<vmem>>, vector<1x128xf32>
      %21 = vector.broadcast %20 : vector<1x128xf32> to vector<256x128xf32>
      %22 = arith.addf %19, %21 : vector<256x128xf32>
      %c0_20 = arith.constant 0 : index
      %c0_21 = arith.constant 0 : index
      %23 = vector.load %arg8[%c0_20, %c0_21] : memref<256x128xf32, #tpu.memory_space<vmem>>, vector<256x128xf32>
      tpu.vector_store %arg8[%c0_20, %c0_21], %22 {strides = array<i32>} : memref<256x128xf32, #tpu.memory_space<vmem>>, vector<256x128xf32>,
    } else {
    }
    return
  }
  func.func @transform_0(%arg0: i32, %arg1: i32, %arg2: i32) -> (i32, i32) {
    %c0_i32 = arith.constant 0 : i32
    %c0_i32_0 = arith.constant 0 : i32
    return %arg0, %c0_i32 : i32, i32
  }
  func.func @transform_1(%arg0: i32, %arg1: i32, %arg2: i32) -> (i32, i32) {
    %c0_i32 = arith.constant 0 : i32
    %c0_i32_0 = arith.constant 0 : i32
    return %c0_i32, %arg2 : i32, i32
  }
  func.func @transform_2(%arg0: i32, %arg1: i32, %arg2: i32) -> (i32, i32) {
    %c0_i32 = arith.constant 0 : i32
    %c0_i32_0 = arith.constant 0 : i32
    return %c0_i32, %arg2 : i32, i32
  }
  func.func @transform_3(%arg0: i32, %arg1: i32, %arg2: i32) -> (i32, i32) {
    %c0_i32 = arith.constant 0 : i32
    return %arg2, %arg1 : i32, i32
  }
  func.func @transform_4(%arg0: i32, %arg1: i32, %arg2: i32) -> (i32, i32) {
    %c0_i32 = arith.constant 0 : i32
    %c0_i32_0 = arith.constant 0 : i32
    return %c0_i32, %arg1 : i32, i32
  }
  func.func @transform_5(%arg0: i32, %arg1: i32, %arg2: i32) -> (i32, i32) {
    %c0_i32 = arith.constant 0 : i32
    return %arg0, %arg1 : i32, i32
  }
}

</mosaic_0001>

<bundles_post_ra>
// kernel: tpu_custom_call.1
= control target key start
LH: loop header
LB: loop body
LE: loop exit
PB: predicated region body
PF: predicated region fallthrough
CT: control target
= control target key end

     0   :  { %10 = vsyncpa [#allocation4], 0  ;;  %s2338_s0 = inlined_call_operand.hbm [shape: f32[512,128], index: 0, kind: input, shape index: {}]   ;;  %s2339_s1 = inlined_call_operand.hbm [shape: f32[128,128], index: 1, kind: input, shape index: {}]   ;;  %s2340_s2 = inlined_call_operand.vmem [shape: f32[1,128], index: 2, kind: input, shape index: {}]   ;;  %s2341_s3 = inlined_call_operand.hbm [shape: f32[128,128], index: 3, kind: input, shape index: {}]   ;;  %s2342_s4 = inlined_call_operand.vmem [shape: f32[1,128], index: 4, kind: input, shape index: {}]   ;;  %s2343_s5 = inlined_call_operand.hbm [shape: f32[512,128], index: 5, kind: output, shape index: {}]  }
   0x1   :  { %12 = vsyncpa [#allocation4 + $0x1], 0 }
   0x2   :  { %13 = vsyncpa [#allocation7], 0 }
   0x3   :  { %14 = vsyncpa [#allocation5], 0 }
   0x4   :  { %16 = vsyncpa [#allocation5 + $0x1], 0  ;;  %s1927_s18 = smov 0   ;;  %s1929_s19 = smov 0  }
   0x5   :  { %s1931_s20 = smov 0   ;;  %s1933_s21 = smov 0  }
   0x6   :  { %s1935_s22 = smov 0   ;;  %s1937_s23 = smov 0  }
   0x7 LB: > { %s1283_s24 = sadd.s32 4294967295, %s1887_s23   ;;  %s1284_s25 = sadd.s32 4294967294, %s1887_s23   ;;  %s1887_s23 = sphi %s1937_s23, %s22_s23   ;;  %s1883_s22 = sphi %s1935_s22, %s2367_s22   ;;  %s1879_s21 = sphi %s1933_s21, %s2366_s21   ;;  %s1875_s20 = sphi %s1931_s20, %s2365_s20   ;;  %s1871_s19 = sphi %s1929_s19, %s2364_s19   ;;  %s1867_s18 = sphi %s1927_s18, %s2363_s18  }
   0x8   : > { %p61_p0 = scmp.ne.s32.totalorder %s1871_s19, %s1867_s18  ;;  %p1961_p1 = scmp.eq.s32.totalorder %s1283_s24, 0 }
   0x9   : > { %p1965_p2 = scmp.eq.s32.totalorder %s1283_s24, 1  ;;  %p199_p3 = scmp.eq.s32.totalorder %s1284_s25, 1 }
   0xa   : > { %s2349_s26 = scalar_select %p1961_p1, 1, 0 }
   0xb   : > { %p1971_p4 = por %p1961_p1, %p61_p0  ;;  %p1285_p5 = scmp.ge.s32.totalorder %s1887_s23, 1 }
   0xc   : > { %p1976_p6 = por %p199_p3, %p61_p0  ;;  %p206_p7 = scmp.lt.s32.totalorder %s1887_s23, 3 }
   0xd   : > { %s2351_s28 = scalar_select %p1971_p4, 1, 0 }
   0xe   : > { %s2352_s29 = scalar_select %p1976_p6, 1, 0 }
   0xf   : > { %p1981_p8 = pnand %p1285_p5, %p206_p7  ;;  %s1889_s6 = smov [#allocation6]  }
  0x10   : > { %s220_s7 = sshll.u32 %s1889_s6, 4  ;;  %s1890_s9 = smov [#allocation8]   ;;  %s1985_s7 = int_to_ptr.vmem [resolvable:$true] %s220_s7 }
  0x11   : > { %p1640_p9 = pneg %p1981_p8  ;;  %s243_s10 = sshll.u32 %s1890_s9, 4  ;;  %s1996_s10 = int_to_ptr.vmem [resolvable:$true] %s243_s10 }
  0x12   : > { %s1715_s13 = scalar_lea.hbm %s2339_s1, 2048 }
  0x13   : > { %p1992_p11 = pnand %p1640_p9, %p1961_p1  ;;  %p1716_p12 = scmp.ne.s32.totalorder %s2339_s1, %s1715_s13 }
  0x14   : > { %p1722_p5 = scmp.lt.u32.totalorder %s1715_s13, %s2339_s1 }
  0x15   : > { %p1717_p13 = pneg %p1992_p11 }
  0x17   : > { %p1718_p0 = pnand %p1717_p13, %p1716_p12 }
  0x19   : > { %p1719_p3 = pneg %p1718_p0 }
  0x1b   : > { %p1724_p7 = pnand %p1722_p5, %p1719_p3 }
  0x1d   : > { %1727 = shalt.err (!%p1724_p7)
}
  0x1e   : > { %s1728_s24 = scalar_lea.vmem %s1985_s7, 2048  ;;  %p1736_p1 = scmp.lt.s32.totalorder %s1985_s7, %s1985_s7 }
  0x1f   : > { %p1729_p9 = scmp.ne.s32.totalorder %s1985_s7, %s1728_s24  ;;  %p1737_p12 = scmp.lt.s32.totalorder %s1728_s24, %s1728_s24 }
  0x21   : > { %p1731_p10 = pnand %p1729_p9, %p1717_p13  ;;  %p1738_p0 = por %p1737_p12, %p1736_p1 }
  0x23   : > { %p1732_p6 = pneg %p1731_p10 }
  0x25   : > { %p1739_p4 = pnand %p1738_p0, %p1732_p6 }
  0x27   : > { %1742 = shalt.err (!%p1739_p4)
}
  0x28   : > { %s2347_s25 = smov 128   ;;  %s1892_s6 = smov 8  }
  0x29   : > { %1643 = dma.hbm_to_vmem [thread:$0]  (!%p1992_p11), %s2339_s1, 2048, %s1985_s7, [#allocation7], %s2347_s25, %s2347_s25, %s1892_s6  }
  0x2a   : > { %s1743_s14 = scalar_lea.hbm %s2341_s3, 2048 }
  0x2b   : > { %p1744_p1 = scmp.ne.s32.totalorder %s2341_s3, %s1743_s14  ;;  %p1750_p10 = scmp.lt.u32.totalorder %s1743_s14, %s2341_s3 }
  0x2d   : > { %p1746_p4 = pnand %p1744_p1, %p1717_p13 }
  0x2f   : > { %p1747_p6 = pneg %p1746_p4 }
  0x31   : > { %p1752_p3 = pnand %p1750_p10, %p1747_p6 }
  0x33   : > { %1755 = shalt.err (!%p1752_p3)
}
  0x34   : > { %s1756_s7 = scalar_lea.vmem %s1996_s10, 2048  ;;  %p1764_p12 = scmp.lt.s32.totalorder %s1996_s10, %s1996_s10 }
  0x35   : > { %p1757_p5 = scmp.ne.s32.totalorder %s1996_s10, %s1756_s7  ;;  %p1765_p0 = scmp.lt.s32.totalorder %s1756_s7, %s1756_s7 }
  0x37   : > { %p1759_p7 = pnand %p1757_p5, %p1717_p13  ;;  %p1766_p1 = por %p1765_p0, %p1764_p12 }
  0x39   : > { %p1760_p9 = pneg %p1759_p7 }
  0x3b   : > { %p1767_p4 = pnand %p1766_p1, %p1760_p9 }
  0x3d   : > { %1770 = shalt.err (!%p1767_p4)
}
  0x3e   : > { %1646 = dma.hbm_to_vmem [thread:$0]  (!%p1992_p11), %s2341_s3, 2048, %s1996_s10, [#allocation7], %s2347_s25, %s2347_s25, %s1892_s6  }
  0x3f   : > { %s41_s8 = sadd.s32 1, %s1883_s22  ;;  %s48_s12 = sadd.s32 1, %s1875_s20 }
  0x40   : > { %p43_p13 = scmp.ge.s32.totalorder %s41_s8, 2  ;;  %p55_p6 = scmp.ne.s32.totalorder %s1875_s20, %s1871_s19 }
  0x41   : > { %p56_p10 = scmp.eq.s32.totalorder %s1887_s23, 0  ;;  %p1657_p3 = scmp.lt.s32.totalorder %s1887_s23, 2 }
  0x42   : > { %s2369_s8 = smov (%p43_p13, %s41_s8), 0  ;;  %p2066_p7 = por %p1965_p2, %p55_p6 }
  0x43   : > { %p57_p5 = por %p56_p10, %p55_p6  ;;  %s45_s14 = ssub.s32 %s1883_s22, %s2369_s8 }
  0x44   : > { %s2355_s13 = scalar_select %p2066_p7, 1, 0 }
  0x45   : > { %s263_s15 = sand.u32 1, %s1875_s20   ;;  %p46_p9 = scmp.eq.s32.totalorder %s45_s14, 0 }
  0x46   : > { %s1291_s10 = sshll.u32 %s263_s15, 8  ;;  %s1306_s16 = sshll.u32 %s1883_s22, 12 }
  0x47   : > { %s2075_s17 = scalar_select %p46_p9, %s1875_s20, %s48_s12  }
  0x48   : > { %s2080_s9 = scalar_lea.hbm %s2338_s0, %s1306_s16  ;;  %s267_s27 = scalar_lea.vmem [#allocation3], %s1291_s10 }
  0x49   : > { %s274_s11 = sshll.u32 %s267_s27, 4  ;;  %p2084_p2 = pnand %p1657_p3, %p57_p5  ;;  %s2088_s11 = int_to_ptr.vmem [resolvable:$true] %s274_s11 }
  0x4a   : > { %s2090_s12 = scalar_lea.sflag [#allocation4], %s263_s15  ;;  %s1771_s14 = scalar_lea.hbm %s2080_s9, 4096 }
  0x4b   : > { %p1772_p11 = scmp.ne.s32.totalorder %s2080_s9, %s1771_s14  ;;  %p1773_p12 = pneg %p2084_p2 }
  0x4c   : > { %s1776_s24 = scalar_lea.hbm %s2338_s0, 8192  ;;  %p1777_p4 = scmp.lt.u32.totalorder %s2080_s9, %s2338_s0 }
  0x4d   : > { %p1774_p0 = pnand %p1773_p12, %p1772_p11  ;;  %p1778_p13 = scmp.lt.u32.totalorder %s1776_s24, %s1771_s14 }
  0x4e   : > { %p1780_p10 = scmp.lt.u32.totalorder %s1771_s14, %s2080_s9 }
  0x4f   : > { %p1775_p1 = pneg %p1774_p0  ;;  %p1779_p6 = por %p1778_p13, %p1777_p4 }
  0x51   : > { %p1781_p3 = por %p1780_p10, %p1779_p6 }
  0x53   : > { %p1782_p5 = pnand %p1781_p3, %p1775_p1 }
  0x55   : > { %1785 = shalt.err (!%p1782_p5)
}
  0x56   : > { %s1786_s15 = scalar_lea.vmem %s2088_s11, 4096  ;;  %s1893_s10 = smov [#allocation3]  }
  0x57   : > { %p1787_p9 = scmp.ne.s32.totalorder %s2088_s11, %s1786_s15  ;;  %s1791_s16 = sshll.u32 %s1893_s10, 4  ;;  %s1792_s16 = int_to_ptr.vmem [resolvable:$false] %s1791_s16 }
  0x58   : > { %s1793_s7 = scalar_lea.vmem %s1792_s16, 8192  ;;  %p1794_p7 = scmp.lt.s32.totalorder %s2088_s11, %s1792_s16 }
  0x59   : > { %p1789_p11 = pnand %p1787_p9, %p1773_p12  ;;  %p1795_p4 = scmp.lt.s32.totalorder %s1793_s7, %s1786_s15 }
  0x5b   : > { %p1790_p0 = pneg %p1789_p11  ;;  %p1796_p13 = por %p1795_p4, %p1794_p7 }
  0x5d   : > { %p1797_p6 = pnand %p1796_p13, %p1790_p0 }
  0x5f   : > { %1800 = shalt.err (!%p1797_p6)
}
  0x60   : > { %s2357_s14 = smov 128   ;;  %286 = sbr.rel (%p1981_p8) target bundleno = 650 (0x28a), region = 40 }
  0x61   : > { %1650 = dma.hbm_to_vmem [thread:$0]  (!%p2084_p2), %s2080_s9, 4096, %s2088_s11, %s2090_s12, %s2357_s14, %s2357_s14, %s1892_s6  }
  0x62   : > { %s2124_s24 = sand.u32 (!%p1981_p8), 1, %s1871_s19   ;;  %p2358_p7 = scmp.ne.s32.totalorder (!%p1981_p8), %s2351_s28, 0 }
  0x63   : > { %s1295_s27 = sshll.u32 (!%p1981_p8), %s2124_s24, 8  ;;  %s289_s15 = scalar_lea.sflag (!%p1981_p8), [#allocation4], %s2124_s24 }
  0x64   : > { %s2130_s25 = scalar_lea.vmem (!%p1981_p8), [#allocation3], %s1295_s27 }
  0x67   : > { %1854 = dma.done.wait (%p2358_p7), %s289_s15, 4096  }
  0x68   : > { %1856 = vsyncadd (%p2358_p7), %s289_s15, 4294963200  ;;  %p2359_p2 = scmp.ne.s32.totalorder %s2349_s26, 0 }
  0x6a   : > { %1858 = dma.done.wait (%p2359_p2), [#allocation7], 4096  }
  0x6b   : > { %1860 = vsyncadd (%p2359_p2), [#allocation7], 4294963200  ;;  %v410_v0 = vld [vmem:[#allocation6] sm:$0xff]  ;;  %v411_v1 = vld [vmem:[#allocation6 + $0x8] sm:$0xff]  ;;  %s2218_s9 = scalar_lea.vmem [#allocation9], %s1295_s27  ;;  %s1307_s11 = sshll.u32 %s1879_s21, 12 }
  0x6c   : > { %v412_v2 = vld [vmem:[#allocation6 + $0x10] sm:$0xff]  ;;  %v1564_v3 = vpack.c.bf16 %v411_v1, %v410_v0  ;;  %v413_v4 = vld [vmem:[#allocation6 + $0x18] sm:$0xff]  ;;  %v414_v6 = vld [vmem:[#allocation6 + $0x20] sm:$0xff]  ;;  %s1148_s12 = sshll.u32 %s2218_s9, 4  ;;  %s2284_s7 = scalar_lea.hbm %s2343_s5, %s1307_s11  ;;  %s2286_s12 = int_to_ptr.vmem [resolvable:$true] %s1148_s12 }
  0x6d   : > { %v1568_v5 = vpack.c.bf16 %v413_v4, %v412_v2  ;;  %v415_v7 = vld [vmem:[#allocation6 + $0x28] sm:$0xff]  ;;  %v378_v9 = vld [vmem:[%s2130_s25] sm:$0xff]  ;;  %v416_v10 = vld [vmem:[#allocation6 + $0x30] sm:$0xff]  ;;  %s1134_s21 = scalar_lea.sflag [#allocation5], %s2124_s24  ;;  %s1801_s14 = scalar_lea.vmem %s2286_s12, 4096 }
  0x6e   : > { %1565 = vmatprep.subr.bf16.mxu0 %v1564_v3  ;;  %v1572_v8 = vpack.c.bf16 %v415_v7, %v414_v6  ;;  %v417_v11 = vld [vmem:[#allocation6 + $0x38] sm:$0xff]  ;;  %1436 = vmatprep.mubr.f32.mxu0 %v378_v9  ;;  %v418_v13 = vld [vmem:[#allocation6 + $0x40] sm:$0xff]  ;;  %v419_v14 = vld [vmem:[#allocation6 + $0x48] sm:$0xff]  ;;  %p1802_p8 = scmp.ne.s32.totalorder %s2286_s12, %s1801_s14  ;;  %p2360_p12 = scmp.ne.s32.totalorder %s2355_s13, 0 }
  0x6f   : > { %1567 = vmatpush3.bf16.msra.mxu0 %v1564_v3  ;;  %v1576_v12 = vpack.c.bf16 %v417_v11, %v416_v10  ;;  %v1580_v15 = vpack.c.bf16 %v419_v14, %v418_v13  ;;  %v420_v16 = vld [vmem:[#allocation6 + $0x50] sm:$0xff]  ;;  %v421_v17 = vld [vmem:[#allocation6 + $0x58] sm:$0xff]  ;;  %v722_v18 = vld [vmem:[#allocation8] sm:$0xff]  ;;  %s1894_s27 = smov [#allocation9]  }
  0x70   : > { %1569 = vmatprep.subr.bf16.mxu0 %v1568_v5  ;;  %v723_v19 = vld [vmem:[#allocation8 + $0x8] sm:$0xff]  ;;  %v724_v20 = vld [vmem:[#allocation8 + $0x10] sm:$0xff]  ;;  %v1584_v21 = vpack.c.bf16 %v421_v17, %v420_v16  ;;  %v422_v22 = vld [vmem:[#allocation6 + $0x60] sm:$0xff]  ;;  %p1803_p1 = pnand %p1802_p8, %p2360_p12  ;;  %s1805_s15 = sshll.u32 %s1894_s27, 4  ;;  %s1806_s15 = int_to_ptr.vmem [resolvable:$false] %s1805_s15 }
  0x71   : > { %v1596_v23 = vpack.c.bf16 %v723_v19, %v722_v18  ;;  %v725_v24 = vld [vmem:[#allocation8 + $0x18] sm:$0xff]  ;;  %v423_v25 = vld [vmem:[#allocation6 + $0x68] sm:$0xff]  ;;  %v726_v27 = vld [vmem:[#allocation8 + $0x20] sm:$0xff]  ;;  %p1808_p3 = scmp.lt.s32.totalorder %s2286_s12, %s1806_s15 }
  0x72   : > { %v1600_v26 = vpack.c.bf16 %v725_v24, %v724_v20  ;;  %v727_v28 = vld [vmem:[#allocation8 + $0x28] sm:$0xff]  ;;  %v1588_v29 = vpack.c.bf16 %v423_v25, %v422_v22  ;;  %v424_v30 = vld [vmem:[#allocation6 + $0x70] sm:$0xff]  ;;  %v425_v32 = vld [vmem:[#allocation6 + $0x78] sm:$0xff]  ;;  %p1804_p10 = pneg %p1803_p1 }
  0x73   : > { %1571 = vmatpush3.bf16.msra.mxu0 %v1568_v5  ;;  %1597 = vmatprep.subr.bf16.mxu1 %v1596_v23  ;;  %v1604_v31 = vpack.c.bf16 %v727_v28, %v726_v27  ;;  %v728_v33 = vld [vmem:[#allocation8 + $0x30] sm:$0xff]  ;;  %v729_v34 = vld [vmem:[#allocation8 + $0x38] sm:$0xff]  ;;  %v1592_v35 = vpack.c.bf16 %v425_v32, %v424_v30  ;;  %v730_v37 = vld [vmem:[#allocation8 + $0x40] sm:$0xff] }
  0x74   : > { %1573 = vmatprep.subr.bf16.mxu0 %v1572_v8  ;;  %1599 = vmatpush3.bf16.msra.mxu1 %v1596_v23  ;;  %v1608_v36 = vpack.c.bf16 %v729_v34, %v728_v33  ;;  %v731_v38 = vld [vmem:[#allocation8 + $0x48] sm:$0xff]  ;;  %v732_v40 = vld [vmem:[#allocation8 + $0x50] sm:$0xff]  ;;  %v733_v41 = vld [vmem:[#allocation8 + $0x58] sm:$0xff] }
  0x75   : > { %1601 = vmatprep.subr.bf16.mxu1 %v1600_v26  ;;  %v1612_v39 = vpack.c.bf16 %v731_v38, %v730_v37  ;;  %v379_v42 = vld [vmem:[%s2130_s25 + $0x8] sm:$0xff]  ;;  %v380_v43 = vld [vmem:[%s2130_s25 + $0x10] sm:$0xff]  ;;  %v1616_v44 = vpack.c.bf16 %v733_v41, %v732_v40  ;;  %v734_v45 = vld [vmem:[#allocation8 + $0x60] sm:$0xff] }
  0x76   : > { %v735_v46 = vld [vmem:[#allocation8 + $0x68] sm:$0xff]  ;;  %v381_v47 = vld [vmem:[%s2130_s25 + $0x18] sm:$0xff]  ;;  %v382_v48 = vld [vmem:[%s2130_s25 + $0x20] sm:$0xff] }
  0x77   : > { %1575 = vmatpush3.bf16.msra.mxu0 %v1572_v8  ;;  %v1620_v49 = vpack.c.bf16 %v735_v46, %v734_v45  ;;  %v383_v50 = vld [vmem:[%s2130_s25 + $0x28] sm:$0xff]  ;;  %v384_v51 = vld [vmem:[%s2130_s25 + $0x30] sm:$0xff]  ;;  %v385_v52 = vld [vmem:[%s2130_s25 + $0x38] sm:$0xff] }
  0x78   : > { %1577 = vmatprep.subr.bf16.mxu0 %v1576_v12  ;;  %1603 = vmatpush3.bf16.msra.mxu1 %v1600_v26  ;;  %v386_v53 = vld [vmem:[%s2130_s25 + $0x40] sm:$0xff]  ;;  %v387_v54 = vld [vmem:[%s2130_s25 + $0x48] sm:$0xff]  ;;  %v388_v55 = vld [vmem:[%s2130_s25 + $0x50] sm:$0xff] }
  0x79   : > { %1605 = vmatprep.subr.bf16.mxu1 %v1604_v31  ;;  %v389_v56 = vld [vmem:[%s2130_s25 + $0x58] sm:$0xff]  ;;  %v390_v57 = vld [vmem:[%s2130_s25 + $0x60] sm:$0xff]  ;;  %v391_v58 = vld [vmem:[%s2130_s25 + $0x68] sm:$0xff] }
  0x7a   : > { %v392_v59 = vld [vmem:[%s2130_s25 + $0x70] sm:$0xff]  ;;  %v393_v60 = vld [vmem:[%s2130_s25 + $0x78] sm:$0xff]  ;;  %v394_v61 = vld [vmem:[%s2130_s25 + $0x80] sm:$0xff] }
  0x7b   : > { %1579 = vmatpush3.bf16.msra.mxu0 %v1576_v12  ;;  %v395_v62 = vld [vmem:[%s2130_s25 + $0x88] sm:$0xff]  ;;  %v396_v63 = vld [vmem:[%s2130_s25 + $0x90] sm:$0xff]  ;;  %v397_v0 = vld [vmem:[%s2130_s25 + $0x98] sm:$0xff] }
  0x7c   : > { %1581 = vmatprep.subr.bf16.mxu0 %v1580_v15  ;;  %1607 = vmatpush3.bf16.msra.mxu1 %v1604_v31  ;;  %v398_v1 = vld [vmem:[%s2130_s25 + $0xa0] sm:$0xff]  ;;  %v399_v2 = vld [vmem:[%s2130_s25 + $0xa8] sm:$0xff]  ;;  %v400_v3 = vld [vmem:[%s2130_s25 + $0xb0] sm:$0xff] }
  0x7d   : > { %1609 = vmatprep.subr.bf16.mxu1 %v1608_v36  ;;  %v401_v4 = vld [vmem:[%s2130_s25 + $0xb8] sm:$0xff]  ;;  %v402_v5 = vld [vmem:[%s2130_s25 + $0xc0] sm:$0xff]  ;;  %v403_v6 = vld [vmem:[%s2130_s25 + $0xc8] sm:$0xff] }
  0x7e   : > { %v404_v7 = vld [vmem:[%s2130_s25 + $0xd0] sm:$0xff]  ;;  %v405_v8 = vld [vmem:[%s2130_s25 + $0xd8] sm:$0xff]  ;;  %v406_v9 = vld [vmem:[%s2130_s25 + $0xe0] sm:$0xff] }
  0x7f   : > { %1583 = vmatpush3.bf16.msra.mxu0 %v1580_v15  ;;  %v407_v10 = vld [vmem:[%s2130_s25 + $0xe8] sm:$0xff]  ;;  %v408_v11 = vld [vmem:[%s2130_s25 + $0xf0] sm:$0xff]  ;;  %v409_v12 = vld [vmem:[%s2130_s25 + $0xf8] sm:$0xff]  ;;  %s1807_s25 = scalar_lea.vmem %s1806_s15, 8192 }
  0x80   : > { %1585 = vmatprep.subr.bf16.mxu0 %v1584_v21  ;;  %1611 = vmatpush3.bf16.msra.mxu1 %v1608_v36  ;;  %v736_v13 = vld [vmem:[#allocation8 + $0x70] sm:$0xff]  ;;  %v737_v14 = vld [vmem:[#allocation8 + $0x78] sm:$0xff]  ;;  %v2175_v16 = vld [vmem:[%s2340_s2] ss:$0 sm:$0xff]  ;;  %p1809_p5 = scmp.lt.s32.totalorder %s1807_s25, %s1801_s14 }
  0x81   : > { %1613 = vmatprep.subr.bf16.mxu1 %v1612_v39  ;;  %v1624_v15 = vpack.c.bf16 %v737_v14, %v736_v13 }
  0x82   : > { %p1810_p9 = por %p1809_p5, %p1808_p3 }
  0x83   : > { %1587 = vmatpush3.bf16.msra.mxu0 %v1584_v21 }
  0x84   : > { %1589 = vmatprep.subr.bf16.mxu0 %v1588_v29  ;;  %1615 = vmatpush3.bf16.msra.mxu1 %v1612_v39  ;;  %p1811_p11 = pnand %p1810_p9, %p1804_p10 }
  0x85   : > { %1617 = vmatprep.subr.bf16.mxu1 %v1616_v44 }
  0x87   : > { %1591 = vmatpush3.bf16.msra.mxu0 %v1588_v29 }
  0x88   : > { %1593 = vmatprep.subr.bf16.mxu0 %v1592_v35  ;;  %1619 = vmatpush3.bf16.msra.mxu1 %v1616_v44 }
  0x89   : > { %1621 = vmatprep.subr.bf16.mxu1 %v1620_v49 }
  0x8b   : > { %1595 = vmatpush3.bf16.msra.mxu0 %v1592_v35 }
  0x8c   : > { %1623 = vmatpush3.bf16.msra.mxu1 %v1620_v49 }
  0x8d   : > { %1625 = vmatprep.subr.bf16.mxu1 %v1624_v15 }
  0x8e   : > { %1437 = vmatmul.mubr.f32.vlgmr.msra.gmra.mrb[0].mxu0 %v379_v42 }
  0x8f   : > { %1439 = vmatprep.mubr.f32.mxu0 %v380_v43 }
  0x90   : > { %1627 = vmatpush3.bf16.msra.mxu1 %v1624_v15 }
  0x92   : > { %1440 = vmatmul.mubr.f32.gmra.mrb[2].mxu0 %v381_v47 }
  0x93   : > { %1442 = vmatprep.mubr.f32.mxu0 %v382_v48 }
  0x96   : > { %1443 = vmatmul.mubr.f32.gmra.mrb[4].mxu0 %v383_v50 }
  0x97   : > { %1445 = vmatprep.mubr.f32.mxu0 %v384_v51 }
  0x9a   : > { %1446 = vmatmul.mubr.f32.gmra.mrb[6].mxu0 %v385_v52 }
  0x9b   : > { %1448 = vmatprep.mubr.f32.mxu0 %v386_v53 }
  0x9e   : > { %1449 = vmatmul.mubr.f32.gmra.mrb[8].mxu0 %v387_v54 }
  0x9f   : > { %1451 = vmatprep.mubr.f32.mxu0 %v388_v55 }
  0xa2   : > { %1452 = vmatmul.mubr.f32.gmra.mrb[10].mxu0 %v389_v56 }
  0xa3   : > { %1454 = vmatprep.mubr.f32.mxu0 %v390_v57 }
  0xa6   : > { %1455 = vmatmul.mubr.f32.gmra.mrb[12].mxu0 %v391_v58 }
  0xa7   : > { %1457 = vmatprep.mubr.f32.mxu0 %v392_v59 }
  0xaa   : > { %1458 = vmatmul.mubr.f32.gmra.mrb[14].mxu0 %v393_v60 }
  0xab   : > { %1460 = vmatprep.mubr.f32.mxu0 %v394_v61 }
  0xae   : > { %1461 = vmatmul.mubr.f32.gmra.mrb[16].mxu0 %v395_v62 }
  0xaf   : > { %1463 = vmatprep.mubr.f32.mxu0 %v396_v63 }
  0xb2   : > { %1464 = vmatmul.mubr.f32.gmra.mrb[18].mxu0 %v397_v0 }
  0xb3   : > { %1466 = vmatprep.mubr.f32.mxu0 %v398_v1 }
  0xb6   : > { %1467 = vmatmul.mubr.f32.gmra.mrb[20].mxu0 %v399_v2 }
  0xb7   : > { %1469 = vmatprep.mubr.f32.mxu0 %v400_v3 }
  0xba   : > { %1470 = vmatmul.mubr.f32.gmra.mrb[22].mxu0 %v401_v4 }
  0xbb   : > { %1472 = vmatprep.mubr.f32.mxu0 %v402_v5 }
  0xbe   : > { %1473 = vmatmul.mubr.f32.gmra.mrb[24].mxu0 %v403_v6 }
  0xbf   : > { %1475 = vmatprep.mubr.f32.mxu0 %v404_v7 }
  0xc2   : > { %1476 = vmatmul.mubr.f32.gmra.mrb[26].mxu0 %v405_v8 }
  0xc3   : > { %1478 = vmatprep.mubr.f32.mxu0 %v406_v9 }
  0xc6   : > { %1479 = vmatmul.mubr.f32.gmra.mrb[28].mxu0 %v407_v10 }
  0xc7   : > { %1481 = vmatprep.mubr.f32.mxu0 %v408_v11 }
  0xca   : > { %1482 = vmatmul.mubr.f32.gmra.mrb[30].mxu0 %v409_v12 }
 0x161   : > { %v1438_v17 = vpop.f32.mrb[0].mxu0 }
 0x162   : > { %v505_v18 = vadd.f32 %v1438_v17, %v2175_v16  ;;  %v499_v19 = vpop.f32.mrb[1].mxu0 }
 0x163   : > { %v500_v20 = vadd.f32 %v2175_v16, %v499_v19 }
 0x164   : > { %v659_v23 = vmax.f32 %v505_v18, 0.0 }
 0x165   : > { %v1441_v21 = vpop.f32.mrb[2].mxu0  ;;  %v658_v22 = vmax.f32 %v500_v20, 0.0 }
 0x166   : > { %v515_v24 = vadd.f32 %v1441_v21, %v2175_v16  ;;  %v509_v25 = vpop.f32.mrb[3].mxu0 }
 0x167   : > { %v510_v26 = vadd.f32 %v2175_v16, %v509_v25  ;;  %1516 = vmatprep.mubr.f32.mxu1 %v658_v22 }
 0x168   : > { %1517 = vmatmul.mubr.f32.vlgmr.msra.gmra.mrb[0].mxu1 %v659_v23  ;;  %v661_v29 = vmax.f32 %v515_v24, 0.0 }
 0x169   : > { %v660_v27 = vmax.f32 %v510_v26, 0.0  ;;  %v1444_v28 = vpop.f32.mrb[4].mxu0 }
 0x16a   : > { %v525_v30 = vadd.f32 %v1444_v28, %v2175_v16  ;;  %v519_v31 = vpop.f32.mrb[5].mxu0 }
 0x16b   : > { %v520_v32 = vadd.f32 %v2175_v16, %v519_v31  ;;  %1519 = vmatprep.mubr.f32.mxu1 %v660_v27 }
 0x16c   : > { %1520 = vmatmul.mubr.f32.gmra.mrb[2].mxu1 %v661_v29  ;;  %v663_v35 = vmax.f32 %v525_v30, 0.0 }
 0x16d   : > { %v662_v33 = vmax.f32 %v520_v32, 0.0  ;;  %v1447_v34 = vpop.f32.mrb[6].mxu0 }
 0x16e   : > { %v535_v36 = vadd.f32 %v1447_v34, %v2175_v16  ;;  %v529_v37 = vpop.f32.mrb[7].mxu0 }
 0x16f   : > { %v530_v38 = vadd.f32 %v2175_v16, %v529_v37  ;;  %1522 = vmatprep.mubr.f32.mxu1 %v662_v33 }
 0x170   : > { %1523 = vmatmul.mubr.f32.gmra.mrb[4].mxu1 %v663_v35  ;;  %v665_v41 = vmax.f32 %v535_v36, 0.0 }
 0x171   : > { %v664_v39 = vmax.f32 %v530_v38, 0.0  ;;  %v1450_v40 = vpop.f32.mrb[8].mxu0 }
 0x172   : > { %v545_v42 = vadd.f32 %v1450_v40, %v2175_v16  ;;  %v539_v43 = vpop.f32.mrb[9].mxu0 }
 0x173   : > { %v540_v44 = vadd.f32 %v2175_v16, %v539_v43  ;;  %1525 = vmatprep.mubr.f32.mxu1 %v664_v39 }
 0x174   : > { %1526 = vmatmul.mubr.f32.gmra.mrb[6].mxu1 %v665_v41  ;;  %v667_v47 = vmax.f32 %v545_v42, 0.0 }
 0x175   : > { %v666_v45 = vmax.f32 %v540_v44, 0.0  ;;  %v1453_v46 = vpop.f32.mrb[10].mxu0 }
 0x176   : > { %v555_v48 = vadd.f32 %v1453_v46, %v2175_v16  ;;  %v549_v49 = vpop.f32.mrb[11].mxu0 }
 0x177   : > { %v550_v50 = vadd.f32 %v2175_v16, %v549_v49  ;;  %1528 = vmatprep.mubr.f32.mxu1 %v666_v45 }
 0x178   : > { %1529 = vmatmul.mubr.f32.gmra.mrb[8].mxu1 %v667_v47  ;;  %v669_v53 = vmax.f32 %v555_v48, 0.0 }
 0x179   : > { %v668_v51 = vmax.f32 %v550_v50, 0.0  ;;  %v1456_v52 = vpop.f32.mrb[12].mxu0  ;;  %v2212_v50 = vld [vmem:[%s2342_s4] ss:$0 sm:$0xff] }
 0x17a   : > { %v565_v54 = vadd.f32 %v1456_v52, %v2175_v16  ;;  %v559_v55 = vpop.f32.mrb[13].mxu0 }
 0x17b   : > { %v560_v56 = vadd.f32 %v2175_v16, %v559_v55  ;;  %1531 = vmatprep.mubr.f32.mxu1 %v668_v51 }
 0x17c   : > { %1532 = vmatmul.mubr.f32.gmra.mrb[10].mxu1 %v669_v53  ;;  %v671_v59 = vmax.f32 %v565_v54, 0.0 }
 0x17d   : > { %v670_v57 = vmax.f32 %v560_v56, 0.0  ;;  %v1459_v58 = vpop.f32.mrb[14].mxu0 }
 0x17e   : > { %v575_v60 = vadd.f32 %v1459_v58, %v2175_v16  ;;  %v569_v61 = vpop.f32.mrb[15].mxu0 }
 0x17f   : > { %v570_v62 = vadd.f32 %v2175_v16, %v569_v61  ;;  %1534 = vmatprep.mubr.f32.mxu1 %v670_v57 }
 0x180   : > { %1535 = vmatmul.mubr.f32.gmra.mrb[12].mxu1 %v671_v59  ;;  %v673_v1 = vmax.f32 %v575_v60, 0.0 }
 0x181   : > { %v672_v63 = vmax.f32 %v570_v62, 0.0  ;;  %v1462_v0 = vpop.f32.mrb[16].mxu0 }
 0x182   : > { %v585_v2 = vadd.f32 %v1462_v0, %v2175_v16  ;;  %v579_v3 = vpop.f32.mrb[17].mxu0 }
 0x183   : > { %v580_v4 = vadd.f32 %v2175_v16, %v579_v3  ;;  %1537 = vmatprep.mubr.f32.mxu1 %v672_v63 }
 0x184   : > { %1538 = vmatmul.mubr.f32.gmra.mrb[14].mxu1 %v673_v1  ;;  %v675_v7 = vmax.f32 %v585_v2, 0.0 }
 0x185   : > { %v674_v5 = vmax.f32 %v580_v4, 0.0  ;;  %v1465_v6 = vpop.f32.mrb[18].mxu0 }
 0x186   : > { %v595_v8 = vadd.f32 %v1465_v6, %v2175_v16  ;;  %v589_v9 = vpop.f32.mrb[19].mxu0 }
 0x187   : > { %v590_v10 = vadd.f32 %v2175_v16, %v589_v9  ;;  %1540 = vmatprep.mubr.f32.mxu1 %v674_v5 }
 0x188   : > { %1541 = vmatmul.mubr.f32.gmra.mrb[16].mxu1 %v675_v7  ;;  %v677_v13 = vmax.f32 %v595_v8, 0.0 }
 0x189   : > { %v676_v11 = vmax.f32 %v590_v10, 0.0  ;;  %v1468_v12 = vpop.f32.mrb[20].mxu0 }
 0x18a   : > { %v605_v14 = vadd.f32 %v1468_v12, %v2175_v16  ;;  %v599_v15 = vpop.f32.mrb[21].mxu0 }
 0x18b   : > { %v600_v17 = vadd.f32 %v2175_v16, %v599_v15  ;;  %1543 = vmatprep.mubr.f32.mxu1 %v676_v11 }
 0x18c   : > { %1544 = vmatmul.mubr.f32.gmra.mrb[18].mxu1 %v677_v13  ;;  %v679_v20 = vmax.f32 %v605_v14, 0.0 }
 0x18d   : > { %v678_v18 = vmax.f32 %v600_v17, 0.0  ;;  %v1471_v19 = vpop.f32.mrb[22].mxu0 }
 0x18e   : > { %v615_v21 = vadd.f32 %v1471_v19, %v2175_v16  ;;  %v609_v22 = vpop.f32.mrb[23].mxu0 }
 0x18f   : > { %v610_v23 = vadd.f32 %v2175_v16, %v609_v22  ;;  %1546 = vmatprep.mubr.f32.mxu1 %v678_v18 }
 0x190   : > { %1547 = vmatmul.mubr.f32.gmra.mrb[20].mxu1 %v679_v20  ;;  %v681_v26 = vmax.f32 %v615_v21, 0.0 }
 0x191   : > { %v680_v24 = vmax.f32 %v610_v23, 0.0  ;;  %v1474_v25 = vpop.f32.mrb[24].mxu0 }
 0x192   : > { %v625_v27 = vadd.f32 %v1474_v25, %v2175_v16  ;;  %v619_v28 = vpop.f32.mrb[25].mxu0 }
 0x193   : > { %v620_v29 = vadd.f32 %v2175_v16, %v619_v28  ;;  %1549 = vmatprep.mubr.f32.mxu1 %v680_v24 }
 0x194   : > { %1550 = vmatmul.mubr.f32.gmra.mrb[22].mxu1 %v681_v26  ;;  %v683_v32 = vmax.f32 %v625_v27, 0.0 }
 0x195   : > { %v682_v30 = vmax.f32 %v620_v29, 0.0  ;;  %v1477_v31 = vpop.f32.mrb[26].mxu0 }
 0x196   : > { %v635_v33 = vadd.f32 %v1477_v31, %v2175_v16  ;;  %v629_v34 = vpop.f32.mrb[27].mxu0 }
 0x197   : > { %v630_v35 = vadd.f32 %v2175_v16, %v629_v34  ;;  %1552 = vmatprep.mubr.f32.mxu1 %v682_v30 }
 0x198   : > { %1553 = vmatmul.mubr.f32.gmra.mrb[24].mxu1 %v683_v32  ;;  %v685_v38 = vmax.f32 %v635_v33, 0.0 }
 0x199   : > { %v684_v36 = vmax.f32 %v630_v35, 0.0  ;;  %v1480_v37 = vpop.f32.mrb[28].mxu0 }
 0x19a   : > { %v645_v39 = vadd.f32 %v1480_v37, %v2175_v16  ;;  %v639_v40 = vpop.f32.mrb[29].mxu0 }
 0x19b   : > { %v640_v41 = vadd.f32 %v2175_v16, %v639_v40  ;;  %1555 = vmatprep.mubr.f32.mxu1 %v684_v36 }
 0x19c   : > { %1556 = vmatmul.mubr.f32.gmra.mrb[26].mxu1 %v685_v38  ;;  %v687_v44 = vmax.f32 %v645_v39, 0.0 }
 0x19d   : > { %v686_v42 = vmax.f32 %v640_v41, 0.0  ;;  %v1483_v43 = vpop.f32.mrb[30].mxu0 }
 0x19e   : > { %v655_v45 = vadd.f32 %v1483_v43, %v2175_v16  ;;  %v649_v46 = vpop.f32.mrb[31].mxu0 }
 0x19f   : > { %v650_v47 = vadd.f32 %v2175_v16, %v649_v46  ;;  %1558 = vmatprep.mubr.f32.mxu1 %v686_v42 }
 0x1a0   : > { %1559 = vmatmul.mubr.f32.gmra.mrb[28].mxu1 %v687_v44  ;;  %v689_v49 = vmax.f32 %v655_v45, 0.0 }
 0x1a1   : > { %v688_v48 = vmax.f32 %v650_v47, 0.0 }
 0x1a3   : > { %1561 = vmatprep.mubr.f32.mxu1 %v688_v48 }
 0x1a4   : > { %1562 = vmatmul.mubr.f32.gmra.mrb[30].mxu1 %v689_v49 }
 0x23b   : > { %v1518_v51 = vpop.f32.mrb[0].mxu1 }
 0x23c   : > { %v1070_v52 = vadd.f32 %v1518_v51, %v2212_v50  ;;  %v804_v53 = vpop.f32.mrb[1].mxu1 }
 0x23d   : > { %v1069_v54 = vadd.f32 %v2212_v50, %v804_v53 }
 0x23e   : > { %1102 = vst [vmem:[%s2218_s9 + $0x8] sm:$0xff] %v1070_v52 }
 0x23f   : > { %1101 = vst [vmem:[%s2218_s9] sm:$0xff] %v1069_v54  ;;  %v1521_v16 = vpop.f32.mrb[2].mxu1 }
 0x240   : > { %v1072_v55 = vadd.f32 %v1521_v16, %v2212_v50  ;;  %v814_v56 = vpop.f32.mrb[3].mxu1 }
 0x241   : > { %v1071_v57 = vadd.f32 %v2212_v50, %v814_v56 }
 0x242   : > { %1104 = vst [vmem:[%s2218_s9 + $0x18] sm:$0xff] %v1072_v55 }
 0x243   : > { %1103 = vst [vmem:[%s2218_s9 + $0x10] sm:$0xff] %v1071_v57  ;;  %v1524_v58 = vpop.f32.mrb[4].mxu1 }
 0x244   : > { %v1074_v59 = vadd.f32 %v1524_v58, %v2212_v50  ;;  %v824_v60 = vpop.f32.mrb[5].mxu1 }
 0x245   : > { %v1073_v61 = vadd.f32 %v2212_v50, %v824_v60 }
 0x246   : > { %1106 = vst [vmem:[%s2218_s9 + $0x28] sm:$0xff] %v1074_v59 }
 0x247   : > { %1105 = vst [vmem:[%s2218_s9 + $0x20] sm:$0xff] %v1073_v61  ;;  %v1527_v62 = vpop.f32.mrb[6].mxu1 }
 0x248   : > { %v1076_v63 = vadd.f32 %v1527_v62, %v2212_v50  ;;  %v834_v0 = vpop.f32.mrb[7].mxu1 }
 0x249   : > { %v1075_v1 = vadd.f32 %v2212_v50, %v834_v0 }
 0x24a   : > { %1108 = vst [vmem:[%s2218_s9 + $0x38] sm:$0xff] %v1076_v63 }
 0x24b   : > { %1107 = vst [vmem:[%s2218_s9 + $0x30] sm:$0xff] %v1075_v1  ;;  %v1530_v2 = vpop.f32.mrb[8].mxu1 }
 0x24c   : > { %v1078_v3 = vadd.f32 %v1530_v2, %v2212_v50  ;;  %v844_v4 = vpop.f32.mrb[9].mxu1 }
 0x24d   : > { %v1077_v5 = vadd.f32 %v2212_v50, %v844_v4 }
 0x24e   : > { %1110 = vst [vmem:[%s2218_s9 + $0x48] sm:$0xff] %v1078_v3 }
 0x24f   : > { %1109 = vst [vmem:[%s2218_s9 + $0x40] sm:$0xff] %v1077_v5  ;;  %v1533_v6 = vpop.f32.mrb[10].mxu1 }
 0x250   : > { %v1080_v7 = vadd.f32 %v1533_v6, %v2212_v50  ;;  %v854_v8 = vpop.f32.mrb[11].mxu1 }
 0x251   : > { %v1079_v9 = vadd.f32 %v2212_v50, %v854_v8 }
 0x252   : > { %1112 = vst [vmem:[%s2218_s9 + $0x58] sm:$0xff] %v1080_v7 }
 0x253   : > { %1111 = vst [vmem:[%s2218_s9 + $0x50] sm:$0xff] %v1079_v9  ;;  %v1536_v10 = vpop.f32.mrb[12].mxu1 }
 0x254   : > { %v1082_v11 = vadd.f32 %v1536_v10, %v2212_v50  ;;  %v864_v12 = vpop.f32.mrb[13].mxu1 }
 0x255   : > { %v1081_v13 = vadd.f32 %v2212_v50, %v864_v12 }
 0x256   : > { %1114 = vst [vmem:[%s2218_s9 + $0x68] sm:$0xff] %v1082_v11 }
 0x257   : > { %1113 = vst [vmem:[%s2218_s9 + $0x60] sm:$0xff] %v1081_v13  ;;  %v1539_v14 = vpop.f32.mrb[14].mxu1 }
 0x258   : > { %v1084_v15 = vadd.f32 %v1539_v14, %v2212_v50  ;;  %v874_v17 = vpop.f32.mrb[15].mxu1 }
 0x259   : > { %v1083_v18 = vadd.f32 %v2212_v50, %v874_v17 }
 0x25a   : > { %1116 = vst [vmem:[%s2218_s9 + $0x78] sm:$0xff] %v1084_v15 }
 0x25b   : > { %1115 = vst [vmem:[%s2218_s9 + $0x70] sm:$0xff] %v1083_v18  ;;  %v1542_v19 = vpop.f32.mrb[16].mxu1 }
 0x25c   : > { %v1086_v20 = vadd.f32 %v1542_v19, %v2212_v50  ;;  %v884_v21 = vpop.f32.mrb[17].mxu1 }
 0x25d   : > { %v1085_v22 = vadd.f32 %v2212_v50, %v884_v21 }
 0x25e   : > { %1118 = vst [vmem:[%s2218_s9 + $0x88] sm:$0xff] %v1086_v20 }
 0x25f   : > { %1117 = vst [vmem:[%s2218_s9 + $0x80] sm:$0xff] %v1085_v22  ;;  %v1545_v23 = vpop.f32.mrb[18].mxu1 }
 0x260   : > { %v1088_v24 = vadd.f32 %v1545_v23, %v2212_v50  ;;  %v894_v25 = vpop.f32.mrb[19].mxu1 }
 0x261   : > { %v1087_v26 = vadd.f32 %v2212_v50, %v894_v25 }
 0x262   : > { %1120 = vst [vmem:[%s2218_s9 + $0x98] sm:$0xff] %v1088_v24 }
 0x263   : > { %1119 = vst [vmem:[%s2218_s9 + $0x90] sm:$0xff] %v1087_v26  ;;  %v1548_v27 = vpop.f32.mrb[20].mxu1 }
 0x264   : > { %v1090_v28 = vadd.f32 %v1548_v27, %v2212_v50  ;;  %v904_v29 = vpop.f32.mrb[21].mxu1 }
 0x265   : > { %v1089_v30 = vadd.f32 %v2212_v50, %v904_v29 }
 0x266   : > { %1122 = vst [vmem:[%s2218_s9 + $0xa8] sm:$0xff] %v1090_v28 }
 0x267   : > { %1121 = vst [vmem:[%s2218_s9 + $0xa0] sm:$0xff] %v1089_v30  ;;  %v1551_v31 = vpop.f32.mrb[22].mxu1 }
 0x268   : > { %v1092_v32 = vadd.f32 %v1551_v31, %v2212_v50  ;;  %v914_v33 = vpop.f32.mrb[23].mxu1 }
 0x269   : > { %v1091_v34 = vadd.f32 %v2212_v50, %v914_v33 }
 0x26a   : > { %1124 = vst [vmem:[%s2218_s9 + $0xb8] sm:$0xff] %v1092_v32 }
 0x26b   : > { %1123 = vst [vmem:[%s2218_s9 + $0xb0] sm:$0xff] %v1091_v34  ;;  %v1554_v35 = vpop.f32.mrb[24].mxu1 }
 0x26c   : > { %v1094_v36 = vadd.f32 %v1554_v35, %v2212_v50  ;;  %v924_v37 = vpop.f32.mrb[25].mxu1 }
 0x26d   : > { %v1093_v38 = vadd.f32 %v2212_v50, %v924_v37 }
 0x26e   : > { %1126 = vst [vmem:[%s2218_s9 + $0xc8] sm:$0xff] %v1094_v36 }
 0x26f   : > { %1125 = vst [vmem:[%s2218_s9 + $0xc0] sm:$0xff] %v1093_v38  ;;  %v1557_v39 = vpop.f32.mrb[26].mxu1 }
 0x270   : > { %v1096_v40 = vadd.f32 %v1557_v39, %v2212_v50  ;;  %v934_v41 = vpop.f32.mrb[27].mxu1 }
 0x271   : > { %v1095_v42 = vadd.f32 %v2212_v50, %v934_v41 }
 0x272   : > { %1128 = vst [vmem:[%s2218_s9 + $0xd8] sm:$0xff] %v1096_v40 }
 0x273   : > { %1127 = vst [vmem:[%s2218_s9 + $0xd0] sm:$0xff] %v1095_v42  ;;  %v1560_v43 = vpop.f32.mrb[28].mxu1 }
 0x274   : > { %v1098_v44 = vadd.f32 %v1560_v43, %v2212_v50  ;;  %v944_v45 = vpop.f32.mrb[29].mxu1 }
 0x275   : > { %v1097_v46 = vadd.f32 %v2212_v50, %v944_v45 }
 0x276   : > { %1130 = vst [vmem:[%s2218_s9 + $0xe8] sm:$0xff] %v1098_v44 }
 0x277   : > { %1129 = vst [vmem:[%s2218_s9 + $0xe0] sm:$0xff] %v1097_v46  ;;  %v1563_v47 = vpop.f32.mrb[30].mxu1 }
 0x278   : > { %v1100_v48 = vadd.f32 %v1563_v47, %v2212_v50  ;;  %v954_v49 = vpop.f32.mrb[31].mxu1 }
 0x279   : > { %v1099_v51 = vadd.f32 %v2212_v50, %v954_v49 }
 0x27a   : > { %1132 = vst [vmem:[%s2218_s9 + $0xf8] sm:$0xff] %v1100_v48 }
 0x27b   : > { %1131 = vst [vmem:[%s2218_s9 + $0xf0] sm:$0xff] %v1099_v51 }
 0x27c   : > { %1814 = shalt.err (!%p1811_p11)
}
 0x27d   : > { %s1815_s26 = scalar_lea.hbm %s2284_s7, 4096  ;;  %s1819_s6 = scalar_lea.hbm %s2343_s5, 8192 }
 0x27e   : > { %p1816_p0 = scmp.ne.s32.totalorder %s2284_s7, %s1815_s26  ;;  %p1820_p6 = scmp.lt.u32.totalorder %s2284_s7, %s2343_s5 }
 0x27f   : > { %p1821_p7 = scmp.lt.u32.totalorder %s1819_s6, %s1815_s26  ;;  %p1823_p8 = scmp.lt.u32.totalorder %s1815_s26, %s2284_s7 }
 0x280   : > { %p1817_p4 = pnand %p1816_p0, %p2360_p12 }
 0x281   : > { %p1822_p2 = por %p1821_p7, %p1820_p6 }
 0x282   : > { %p1818_p13 = pneg %p1817_p4 }
 0x283   : > { %p1824_p1 = por %p1823_p8, %p1822_p2 }
 0x285   : > { %p1825_p10 = pnand %p1824_p1, %p1818_p13 }
 0x287   : > { %1828 = shalt.err (!%p1825_p10)
}
 0x288   : > { %s1895_s10 = smov 128   ;;  %s1896_s16 = smov 8  }
 0x289   : > { %1638 = dma.vmem_to_hbm [thread:$0]  (%p2360_p12), %s2286_s12, 4096, %s2284_s7, %s1134_s21, %s1895_s10, %s1895_s10, %s1896_s16  }
 0x28a PF: > { %s1163_s14 = sand.u32 1, %s1867_s18   ;;  %p2361_p3 = scmp.ne.s32.totalorder %s2352_s29, 0 }
 0x28b   : > { %p2362_p5 = scmp.ge.s32.totalorder %s1887_s23, 2  ;;  %s1164_s27 = scalar_lea.sflag [#allocation5], %s1163_s14 }
 0x28d   : > { %p1652_p9 = pnand %p2362_p5, %p2361_p3 }
 0x28f   : > { %1862 = dma.done.wait (!%p1652_p9), %s1164_s27, 4096  }
 0x290   : > { %1864 = vsyncadd (!%p1652_p9), %s1164_s27, 4294963200  ;;  %s22_s23 = sadd.s32 1, %s1887_s23   ;;  %s2363_s18 = smov %s1871_s19 }
 0x291   : > { %p19_p11 = scmp.ge.s32.totalorder %s22_s23, 4   ;;  %s2364_s19 = smov %s1875_s20 }
 0x292   : > { %s2365_s20 = smov %s2075_s17  ;;  %s2366_s21 = smov %s1883_s22 }
 0x293   : > { %s2367_s22 = smov %s2369_s8  ;;  %21 = sbr.rel (!%p19_p11) target bundleno = 7 (0x7), region = 109 }
 0x29a   :  { %1169 = vsyncpa [#allocation4], 1 }
 0x29b   :  { %1171 = vsyncpa [#allocation4 + $0x1], 1 }
 0x29c   :  { %1172 = vsyncpa [#allocation7], 1 }
 0x29d   :  { %1173 = vsyncpa [#allocation5], 1 }
 0x29e   :  { %1175 = vsyncpa [#allocation5 + $0x1], 1 }

</bundles_post_ra>
